<compile_context>
chip_gen: v6e
topology: v6e:2x2x1
jax: 0.10.0
libtpu: 0.0.40
codegen_flags: <defaults>
</compile_context>

<pallas_src>
import math

import jax
import jax.numpy as jnp
from jax.experimental import pallas as pl
from jax.experimental.pallas import tpu as pltpu


def _pe_add_kernel(x_ref, pe_ref, o_ref):
    # x_ref: (TB, S*D) block, pe_ref: (1, S*D) block (same for every grid step).
    # pe broadcasts over the row (sublane) axis; add stays in the input dtype.
    o_ref[...] = (x_ref[...] + pe_ref[...]).astype(o_ref.dtype)


def make_positional_encoding_table(d_model: int, max_len: int = 5000) -> jnp.ndarray:
    """Deterministic sinusoidal table, identical to the PyTorch __init__."""
    position = jnp.arange(0, max_len, dtype=jnp.float32)[:, None]            # (max_len, 1)
    div_term = jnp.exp(
        jnp.arange(0, d_model, 2, dtype=jnp.float32) * (-math.log(10000.0) / d_model)
    )                                                                         # (ceil(D/2),)
    angles = position * div_term                                              # (max_len, ceil(D/2))
    pe = jnp.zeros((max_len, d_model), dtype=jnp.float32)
    pe = pe.at[:, 0::2].set(jnp.sin(angles))
    pe = pe.at[:, 1::2].set(jnp.cos(angles)[:, : (d_model // 2)])
    return pe


def _choose_row_block(rows: int, row_bytes: int, target_bytes: int = 2 * 1024 * 1024) -> int:
    """Pick how many flattened rows to process per grid step (~target_bytes/buffer)."""
    if rows * row_bytes <= target_bytes:
        return rows                      # whole array in one block (block == full dims)
    tb = max(1, target_bytes // row_bytes)
    if tb >= 8:
        tb = (tb // 8) * 8               # keep sublane dim a multiple of 8
    return min(tb, rows)


def positional_encoding_forward(x: jnp.ndarray, pe: jnp.ndarray) -> jnp.ndarray:
    """x: (B, C, S, D), pe: (max_len, D) -> x + pe[:S] broadcast over (B, C)."""
    B, C, S, D = x.shape
    rows = B * C
    cols = S * D

    # Lane-dense flattening + dtype alignment (cheap wrapper glue, no compute).
    x_flat = x.reshape(rows, cols)
    pe_row = pe[:S, :].astype(x.dtype).reshape(1, cols)

    itemsize = jnp.dtype(x.dtype).itemsize
    tb = _choose_row_block(rows, cols * itemsize)
    grid = (pl.cdiv(rows, tb),)
    # NOTE: for extremely long sequences (cols * itemsize >> a few MiB) the lane
    # axis could additionally be tiled in multiples of 128 to bound VMEM; not
    # needed at these shapes.

    out_flat = pl.pallas_call(
        _pe_add_kernel,
        out_shape=jax.ShapeDtypeStruct((rows, cols), x.dtype),
        grid_spec=pltpu.PrefetchScalarGridSpec(
            num_scalar_prefetch=0,
            grid=grid,
            in_specs=[
                pl.BlockSpec((tb, cols), lambda i: (i, 0)),
                pl.BlockSpec((1, cols), lambda i: (0, 0)),
            ],
            out_specs=pl.BlockSpec((tb, cols), lambda i: (i, 0)),
        ),
        compiler_params=pltpu.CompilerParams(
            dimension_semantics=("parallel",),
            vmem_limit_bytes=32 * 1024 * 1024,
        ),
    )(x_flat, pe_row)

    return out_flat.reshape(B, C, S, D)


if __name__ == "__main__":
    # Small shapes consistent with the module: x is 4-D, axis 2 is the
    # "sequence" axis indexing into pe, last axis is d_model.
    B, C, S, D = 2, 4, 8, 32
    key = jax.random.PRNGKey(0)
    x = jax.random.normal(key, (B, C, S, D), dtype=jnp.float32)

    pe = make_positional_encoding_table(d_model=D, max_len=5000)

    out = positional_encoding_forward(x, pe)
    out = jax.block_until_ready(out)

    # Reference check in plain JAX (mirrors PyTorch broadcast exactly).
    ref = x + pe[:S, :][None, None, :, :]
    assert out.shape == x.shape and out.dtype == x.dtype
    assert jnp.allclose(out, ref, atol=1e-6), "mismatch vs reference"

    print("KERNEL_OK")
</pallas_src>

<mosaic_0001>
module attributes {stable_mosaic.version = 11 : i64} {
  func.func @_pe_add_kernel(%arg0: i32, %arg1: memref<8x256xf32, #tpu.memory_space<vmem>>, %arg2: memref<1x256xf32, #tpu.memory_space<vmem>>, %arg3: memref<8x256xf32, #tpu.memory_space<vmem>>) attributes {dimension_semantics = [#tpu.dimension_semantics<parallel>], iteration_bounds = array<i64: 1>, scalar_prefetch = 0 : i64, scratch_operands = 0 : i64, tpu.core_type = #tpu.core_type<tc>, window_params = [{transform_indices = @transform_0, window_bounds = array<i64: 8, 256>}, {pipeline_mode = #tpu.pipeline_mode<synchronous>, transform_indices = @transform_1, window_bounds = array<i64: 1, 256>}, {transform_indices = @transform_2, window_bounds = array<i64: 8, 256>}]} {
    %c0 = arith.constant 0 : index
    %c0_0 = arith.constant 0 : index
    %0 = vector.load %arg1[%c0, %c0_0] : memref<8x256xf32, #tpu.memory_space<vmem>>, vector<8x256xf32>
    %c0_1 = arith.constant 0 : index
    %c0_2 = arith.constant 0 : index
    %1 = vector.load %arg2[%c0_1, %c0_2] : memref<1x256xf32, #tpu.memory_space<vmem>>, vector<1x256xf32>
    %2 = vector.broadcast %1 : vector<1x256xf32> to vector<8x256xf32>
    %3 = arith.addf %0, %2 : vector<8x256xf32>
    %c0_3 = arith.constant 0 : index
    %c0_4 = arith.constant 0 : index
    %4 = vector.load %arg3[%c0_3, %c0_4] : memref<8x256xf32, #tpu.memory_space<vmem>>, vector<8x256xf32>
    tpu.vector_store %arg3[%c0_3, %c0_4], %3 {strides = array<i32>} : memref<8x256xf32, #tpu.memory_space<vmem>>, vector<8x256xf32>,
    return
  }
  func.func @transform_0(%arg0: i32) -> (i32, i32) {
    %c0_i32 = arith.constant 0 : i32
    %c0_i32_0 = arith.constant 0 : i32
    return %arg0, %c0_i32 : i32, i32
  }
  func.func @transform_1(%arg0: i32) -> (i32, i32) {
    %c0_i32 = arith.constant 0 : i32
    %c0_i32_0 = arith.constant 0 : i32
    %c0_i32_1 = arith.constant 0 : i32
    return %c0_i32, %c0_i32_0 : i32, i32
  }
  func.func @transform_2(%arg0: i32) -> (i32, i32) {
    %c0_i32 = arith.constant 0 : i32
    %c0_i32_0 = arith.constant 0 : i32
    return %arg0, %c0_i32 : i32, i32
  }
}

</mosaic_0001>

<bundles_post_ra>
// kernel: tpu_custom_call.1
= control target key start
LH: loop header
LB: loop body
LE: loop exit
PB: predicated region body
PF: predicated region fallthrough
CT: control target
= control target key end

     0   :  { %7 = vsyncpa [#allocation3], 0  ;;  %s166_s0 = inlined_call_operand.hbm [shape: f32[8,256], index: 0, kind: input, shape index: {}]   ;;  %s167_s1 = inlined_call_operand.hbm [shape: f32[1,256], index: 1, kind: input, shape index: {}]   ;;  %s168_s2 = inlined_call_operand.hbm [shape: f32[8,256], index: 2, kind: output, shape index: {}]  }
   0x1   :  { %8 = vsyncpa [#allocation6], 0 }
   0x2   :  { %9 = vsyncpa [#allocation4], 0  ;;  %s139_s9 = smov [#allocation2]   ;;  %s140_s11 = smov [#allocation5]  }
   0x3   :  { %s16_s10 = sshll.u32 %s139_s9, 4  ;;  %s26_s12 = sshll.u32 %s140_s11, 4  ;;  %s17_s10 = int_to_ptr.vmem [resolvable:$true] %s16_s10  ;;  %s27_s12 = int_to_ptr.vmem [resolvable:$true] %s26_s12 }
   0x4   :  { %s81_s13 = scalar_lea.vmem %s17_s10, 256  ;;  %p86_p1 = scmp.lt.s32.totalorder %s17_s10, %s17_s10 }
   0x5   :  { %p82_p0 = scmp.ne.s32.totalorder %s17_s10, %s81_s13  ;;  %p87_p2 = scmp.lt.s32.totalorder %s81_s13, %s81_s13 }
   0x7   :  { %p88_p3 = por %p87_p2, %p86_p1 }
   0x9   :  { %p89_p4 = pnand %p88_p3, %p82_p0 }
   0xb   :  { %92 = shalt.err (!%p89_p4)
}
   0xc   :  { %19 = dma.hbm_to_vmem [thread:$0]  %s166_s0, 256, %s17_s10, [#allocation3]  }
   0xd   :  { %s101_s16 = scalar_lea.vmem %s27_s12, 32  ;;  %p106_p6 = scmp.lt.s32.totalorder %s27_s12, %s27_s12 }
   0xe   :  { %p102_p5 = scmp.ne.s32.totalorder %s27_s12, %s101_s16  ;;  %p107_p7 = scmp.lt.s32.totalorder %s101_s16, %s101_s16 }
  0x10   :  { %p108_p8 = por %p107_p7, %p106_p6 }
  0x12   :  { %p109_p9 = pnand %p108_p8, %p102_p5 }
  0x14   :  { %112 = shalt.err (!%p109_p9)
}
  0x15   :  { %29 = dma.hbm_to_vmem [thread:$0]  %s167_s1, 32, %s27_s12, [#allocation6]  }
  0x16   :  { %133 = dma.done.wait [#allocation3], 256  }
  0x17   :  { %134 = vsyncadd [#allocation3], 4294967040 }
  0x18   :  { %135 = dma.done.wait [#allocation6], 32  }
  0x19   :  { %136 = vsyncadd [#allocation6], 4294967264  ;;  %v40_v0 = vlaneseq  ;;  %v36_v4 = vld [vmem:[#allocation2] sm:$0xff]  ;;  %v38_v5 = vld [vmem:[#allocation5] sm:$0x3]  ;;  %s141_s0 = smov [#allocation7]  }
  0x1a   :  { %v37_v6 = vld [vmem:[#allocation2 + $0x8] sm:$0xff]  ;;  %s60_s19 = sshll.u32 %s141_s0, 4  ;;  %s61_s19 = int_to_ptr.vmem [resolvable:$true] %s60_s19 }
  0x1b   :  { %v41_v1 = vshrl.u32 %v40_v0, 7  ;;  %s113_s1 = scalar_lea.vmem %s61_s19, 256  ;;  %p118_p11 = scmp.lt.s32.totalorder %s61_s19, %s61_s19 }
  0x1c   :  { %p114_p10 = scmp.ne.s32.totalorder %s61_s19, %s113_s1  ;;  %p119_p12 = scmp.lt.s32.totalorder %s113_s1, %s113_s1 }
  0x1d   :  { %v42_v2 = vsub.s32 0, %v41_v1  ;;  %v46_v3 = vsub.s32 1, %v41_v1 }
  0x1e   :  { %p120_p13 = por %p119_p12, %p118_p11 }
  0x1f   :  { %v43_v7 = vrot.slane %v38_v5, %v42_v2  ;;  %v47_v8 = vrot.slane %v38_v5, %v46_v3 }
  0x20   :  { %p121_p0 = pnand %p120_p13, %p114_p10 }
  0x21   :  { %v50_v9 = vadd.f32 %v43_v7, %v36_v4  ;;  %v51_v10 = vadd.f32 %v47_v8, %v37_v6 }
  0x23   :  { %52 = vst [vmem:[#allocation7] sm:$0xff] %v50_v9  ;;  %53 = vst [vmem:[#allocation7 + $0x8] sm:$0xff] %v51_v10 }
  0x24   :  { %124 = shalt.err (!%p121_p0)
}
  0x25   :  { %63 = dma.vmem_to_hbm [thread:$0]  %s61_s19, 256, %s168_s2, [#allocation4]  }
  0x26   :  { %137 = dma.done.wait [#allocation4], 256  }
  0x27   :  { %138 = vsyncadd [#allocation4], 4294967040 }
  0x28   :  { %67 = vsyncpa [#allocation3], 1 }
  0x29   :  { %68 = vsyncpa [#allocation6], 1 }
  0x2a   :  { %69 = vsyncpa [#allocation4], 1 }

</bundles_post_ra>
